<compile_context>
chip_gen: v7x
topology: tpu7x:2x2x1
jax: 0.10.0
libtpu: 0.0.40
codegen_flags: <defaults>
</compile_context>

<pallas_src>
import functools
from typing import Tuple

import jax
import jax.numpy as jnp
from jax.experimental import pallas as pl
from jax.experimental.pallas import tpu as pltpu


def _patch_proj_kernel(x_ref, w_ref, b_ref, o_ref):
    # x_ref: (TM, K) bf16 patch rows; w_ref: (K, E) bf16; b_ref: (1, E) f32.
    acc = jnp.dot(x_ref[...], w_ref[...], preferred_element_type=jnp.float32)
    o_ref[...] = (acc + b_ref[...]).astype(o_ref.dtype)


def patch_embed_forward(
    x,
    weight,
    bias,
    patch_size: Tuple[int, int],
    *,
    compute_dtype=jnp.bfloat16,
    tile_m: int = 512,
    channels_last_output: bool = False,
):
    """Equivalent of PatchEmbed.forward (norm_layer=None).

    x:      (B, C, H, W)    float32, NCHW like PyTorch
    weight: (E, C, Ph, Pw)  conv weight
    bias:   (E,)            conv bias
    returns (B, E, Hp, Wp)  (or (B, Hp, Wp, E) if channels_last_output=True)
    """
    ph, pw = patch_size
    B, C, H, W = x.shape
    E = weight.shape[0]

    # Same padding semantics as F.pad in the reference forward (right/bottom).
    pad_w = (pw - W % pw) % pw
    pad_h = (ph - H % ph) % ph
    if pad_w or pad_h:
        x = jnp.pad(x, ((0, 0), (0, 0), (0, pad_h), (0, pad_w)))
    Hp = (H + pad_h) // ph
    Wp = (W + pad_w) // pw

    # Patch extraction: single fused XLA transpose pass over the activation.
    # TODO(synk): fusing this extraction into the kernel via BlockSpec needs
    # ph>=8 row blocks (8,128 constraint); kept XLA-side for ph<8 generality.
    patches = x.reshape(B, C, Hp, ph, Wp, pw)
    patches = patches.transpose(0, 2, 4, 1, 3, 5).reshape(B * Hp * Wp, C * ph * pw)

    K = C * ph * pw
    M = B * Hp * Wp

    # Conv weight (E, C, ph, pw) -> (K, E), matching the (c, ph, pw) flatten.
    w_mat = weight.reshape(E, K).T

    # bf16 operands for the MXU (also halves HBM traffic); f32 accumulation.
    patches_c = patches.astype(compute_dtype)
    w_c = w_mat.astype(compute_dtype)
    b_mat = bias.reshape(1, E).astype(jnp.float32)

    # M-tile: tile_m rows (multiple of 8) when M is large, else the full M
    # (full-extent blocks always satisfy the (8,128) constraint).
    tm = tile_m if M >= tile_m else M
    grid_m = pl.cdiv(M, tm)

    out_dtype = x.dtype
    itm = jnp.dtype(compute_dtype).itemsize
    ito = jnp.dtype(out_dtype).itemsize

    # VMEM budget: 2x activation tile + resident weight/bias + 2x output tile.
    vmem_bytes = 2 * tm * K * itm + K * E * itm + 2 * E * 4 + 2 * tm * E * ito
    vmem_limit = int(min(max(2 * vmem_bytes, 8 * 1024 * 1024), 48 * 1024 * 1024))

    cost = pl.CostEstimate(
        flops=2 * M * K * E,
        transcendentals=0,
        bytes_accessed=M * K * itm + K * E * itm + E * 4 + M * E * ito,
    )

    out = pl.pallas_call(
        _patch_proj_kernel,
        out_shape=jax.ShapeDtypeStruct((M, E), out_dtype),
        grid_spec=pltpu.PrefetchScalarGridSpec(
            num_scalar_prefetch=0,
            grid=(grid_m,),
            in_specs=[
                pl.BlockSpec((tm, K), lambda i: (i, 0)),  # activation stream
                pl.BlockSpec((K, E), lambda i: (0, 0)),   # weight: VMEM-resident
                pl.BlockSpec((1, E), lambda i: (0, 0)),   # bias:   VMEM-resident
            ],
            out_specs=pl.BlockSpec((tm, E), lambda i: (i, 0)),
        ),
        compiler_params=pltpu.CompilerParams(
            dimension_semantics=("parallel",),   # v7x: shard M over both TCs
            vmem_limit_bytes=vmem_limit,
        ),
        cost_estimate=cost,
    )(patches_c, w_c, b_mat)

    out = out.reshape(B, Hp, Wp, E)
    if channels_last_output:
        return out                       # (B, Hp, Wp, E): saves one HBM pass
    return out.transpose(0, 3, 1, 2)     # NCHW (B, E, Hp, Wp), PyTorch layout


def init_patch_embed_params(key, patch_size, in_chans, embed_dim):
    """Deterministic xavier_uniform_ weight (dim>1), zero bias — matches
    _reset_parameters() semantics (bias zeroed by c2_xavier_fill, weight
    overwritten with xavier_uniform_)."""
    ph, pw = patch_size
    fan_in = in_chans * ph * pw
    fan_out = embed_dim
    limit = (6.0 / (fan_in + fan_out)) ** 0.5
    weight = jax.random.uniform(
        key, (embed_dim, in_chans, ph, pw), jnp.float32, minval=-limit, maxval=limit
    )
    bias = jnp.zeros((embed_dim,), jnp.float32)
    return weight, bias


if __name__ == "__main__":
    key = jax.random.PRNGKey(0)
    k_x, k_w = jax.random.split(key)

    # Small shapes consistent with the module: B=2, C=4, H=W=16, patch=4, E=32.
    patch_size = (4, 4)
    in_chans = 4
    embed_dim = 32
    x = jax.random.normal(k_x, (2, in_chans, 16, 16), jnp.float32)

    weight, bias = init_patch_embed_params(k_w, patch_size, in_chans, embed_dim)

    fwd = jax.jit(functools.partial(patch_embed_forward, patch_size=patch_size))
    out = jax.block_until_ready(fwd(x, weight, bias))

    # Reference: strided conv (== nn.Conv2d with k=stride=patch).  Operands are
    # rounded to bf16 to mirror the kernel's bf16 MXU feed with f32 accumulate.
    x_r = x.astype(jnp.bfloat16).astype(jnp.float32)
    w_r = weight.astype(jnp.bfloat16).astype(jnp.float32)
    ref = jax.lax.conv_general_dilated(
        x_r, w_r, window_strides=patch_size, padding="VALID",
        dimension_numbers=("NCHW", "OIHW", "NCHW"),
        precision=jax.lax.Precision.HIGHEST,
    ) + bias.reshape(1, embed_dim, 1, 1)

    assert out.shape == ref.shape == (2, embed_dim, 4, 4)
    max_err = float(jnp.max(jnp.abs(out - ref)))
    assert jnp.allclose(out, ref, atol=2e-3, rtol=2e-3), max_err

    print("KERNEL_OK")
</pallas_src>

<mosaic_0001>
module attributes {stable_mosaic.version = 11 : i64} {
  func.func @_patch_proj_kernel(%arg0: i32, %arg1: memref<32x64xbf16, #tpu.memory_space<vmem>>, %arg2: memref<64x32xbf16, #tpu.memory_space<vmem>>, %arg3: memref<1x32xf32, #tpu.memory_space<vmem>>, %arg4: memref<32x32xf32, #tpu.memory_space<vmem>>) attributes {dimension_semantics = [#tpu.dimension_semantics<parallel>], iteration_bounds = array<i64: 1>, scalar_prefetch = 0 : i64, scratch_operands = 0 : i64, tpu.core_type = #tpu.core_type<tc>, window_params = [{transform_indices = @transform_0, window_bounds = array<i64: 32, 64>}, {pipeline_mode = #tpu.pipeline_mode<synchronous>, transform_indices = @transform_1, window_bounds = array<i64: 64, 32>}, {pipeline_mode = #tpu.pipeline_mode<synchronous>, transform_indices = @transform_2, window_bounds = array<i64: 1, 32>}, {transform_indices = @transform_3, window_bounds = array<i64: 32, 32>}]} {
    %c0 = arith.constant 0 : index
    %c0_0 = arith.constant 0 : index
    %0 = vector.load %arg1[%c0, %c0_0] : memref<32x64xbf16, #tpu.memory_space<vmem>>, vector<32x64xbf16>
    %c0_1 = arith.constant 0 : index
    %c0_2 = arith.constant 0 : index
    %1 = vector.load %arg2[%c0_1, %c0_2] : memref<64x32xbf16, #tpu.memory_space<vmem>>, vector<64x32xbf16>
    %cst = arith.constant dense<0.000000e+00> : vector<32x32xf32>
    %2 = tpu.matmul %0, %1, %cst {dimension_numbers = #tpu.dot_dimension_numbers<[1], [0], [0], [1], [0, 0, 1, 1], [], []>} : vector<32x64xbf16>, vector<64x32xbf16>, vector<32x32xf32> -> vector<32x32xf32>
    %c0_3 = arith.constant 0 : index
    %c0_4 = arith.constant 0 : index
    %3 = vector.load %arg3[%c0_3, %c0_4] : memref<1x32xf32, #tpu.memory_space<vmem>>, vector<1x32xf32>
    %4 = vector.broadcast %3 : vector<1x32xf32> to vector<32x32xf32>
    %5 = arith.addf %2, %4 : vector<32x32xf32>
    %c0_5 = arith.constant 0 : index
    %c0_6 = arith.constant 0 : index
    %6 = vector.load %arg4[%c0_5, %c0_6] : memref<32x32xf32, #tpu.memory_space<vmem>>, vector<32x32xf32>
    tpu.vector_store %arg4[%c0_5, %c0_6], %5 {strides = array<i32>} : memref<32x32xf32, #tpu.memory_space<vmem>>, vector<32x32xf32>,
    return
  }
  func.func @transform_0(%arg0: i32) -> (i32, i32) {
    %c0_i32 = arith.constant 0 : i32
    %c0_i32_0 = arith.constant 0 : i32
    return %arg0, %c0_i32 : i32, i32
  }
  func.func @transform_1(%arg0: i32) -> (i32, i32) {
    %c0_i32 = arith.constant 0 : i32
    %c0_i32_0 = arith.constant 0 : i32
    %c0_i32_1 = arith.constant 0 : i32
    return %c0_i32, %c0_i32_0 : i32, i32
  }
  func.func @transform_2(%arg0: i32) -> (i32, i32) {
    %c0_i32 = arith.constant 0 : i32
    %c0_i32_0 = arith.constant 0 : i32
    %c0_i32_1 = arith.constant 0 : i32
    return %c0_i32, %c0_i32_0 : i32, i32
  }
  func.func @transform_3(%arg0: i32) -> (i32, i32) {
    %c0_i32 = arith.constant 0 : i32
    %c0_i32_0 = arith.constant 0 : i32
    return %arg0, %c0_i32 : i32, i32
  }
}

</mosaic_0001>

<bundles_post_ra>
// kernel: patch_embed_forward.1
= control target key start
LH: loop header
LB: loop body
LE: loop exit
PB: predicated region body
PF: predicated region fallthrough
CT: control target
= control target key end

     0   :  { %vm69_vm0 = vcmask 523264   ;;  %s262_s0 = inlined_call_operand.vmem [shape: bf16[32,64], index: 0, kind: input, shape index: {}]   ;;  %s263_s1 = inlined_call_operand.vmem [shape: bf16[64,32], index: 1, kind: input, shape index: {}]   ;;  %s264_s2 = inlined_call_operand.vmem [shape: f32[1,32], index: 2, kind: input, shape index: {}]   ;;  %s265_s3 = inlined_call_operand.hbm [shape: f32[32,32], index: 3, kind: output, shape index: {}]  }
   0x1   :  { %v176_v0 = vld [vmem:[%s263_s1] sm:$0xff]   ;;  %v177_v1 = vld [vmem:[%s263_s1 + $0x8] sm:$0xff]   ;;  %v178_v2 = vld [vmem:[%s263_s1 + $0x10] sm:$0xff]  }
   0x2   :  { %161 = vmatprep.subr.bf16.mxu0 %v176_v0  ;;  %v180_v3 = vld [vmem:[%s262_s0] sm:$0xff]  }
   0x3   :  { %162 = vmatpush3.bf16.msra.mxu0 %v176_v0  ;;  %169 = vmatprep.mubr.msk.bf16.mxu0 %vm69_vm0, %v180_v3 }
   0x4   :  { %163 = vmatprep.subr.bf16.mxu0 %v177_v1 }
   0x5   :  { %8 = vsyncpa [#allocation3], 0  ;;  %v179_v4 = vld [vmem:[%s263_s1 + $0x18] sm:$0xff]   ;;  %v181_v5 = vld [vmem:[%s262_s0 + $0x8] sm:$0xff]   ;;  %vm125_vm1 = vcmask 261120   ;;  %s206_s26 = smov [#allocation2]  }
   0x6   :  { %v146_v6 = vld [vmem:[%s264_s2] ss:$0 sm:$0xff]  ;;  %s135_s27 = sshll.u32 %s206_s26, 4  ;;  %s136_s27 = int_to_ptr.vmem [resolvable:$true] %s135_s27 }
   0x7   :  { %164 = vmatpush3.bf16.msra.mxu0 %v177_v1  ;;  %s182_s0 = scalar_lea.vmem %s136_s27, 512  ;;  %p187_p1 = scmp.lt.s32.totalorder %s136_s27, %s136_s27 }
   0x8   :  { %165 = vmatprep.subr.bf16.mxu0 %v178_v2  ;;  %p183_p0 = scmp.ne.s32.totalorder %s136_s27, %s182_s0  ;;  %p188_p2 = scmp.lt.s32.totalorder %s182_s0, %s182_s0 }
   0xa   :  { %p189_p3 = por %p188_p2, %p187_p1 }
   0xb   :  { %166 = vmatpush3.bf16.msra.mxu0 %v178_v2 }
   0xc   :  { %167 = vmatprep.subr.bf16.mxu0 %v179_v4  ;;  %p190_p4 = pnand %p189_p3, %p183_p0 }
   0xf   :  { %168 = vmatpush3.bf16.msra.mxu0 %v179_v4 }
  0x12   :  { %170 = vmatmul.mubr.msk.bf16.vlgmr.msra.gmra.mrb[0].mxu0 %vm69_vm0, %v181_v5 }
  0xe5   :  { %v171_v7 = vpop.f32.mrb[0].mxu0 }
  0xe6   :  { %v119_v8 = vadd.f32 %v171_v7, %v146_v6  ;;  %v110_v9 = vpop.f32.mrb[1].mxu0 }
  0xe7   :  { %v111_v10 = vadd.f32 %v146_v6, %v110_v9  ;;  %v172_v11 = vpop.f32.mrb[2].mxu0 }
  0xe8   :  { %128 = vst.msk [vmem:[#allocation2 + $0x10] sm:$0xff] %vm125_vm1, %v119_v8  ;;  %v122_v12 = vadd.f32 %v172_v11, %v146_v6  ;;  %v113_v13 = vpop.f32.mrb[3].mxu0 }
  0xe9   :  { %126 = vst.msk [vmem:[#allocation2] sm:$0xff] %vm125_vm1, %v111_v10  ;;  %v114_v14 = vadd.f32 %v146_v6, %v113_v13 }
  0xea   :  { %129 = vst.msk [vmem:[#allocation2 + $0x18] sm:$0xff] %vm125_vm1, %v122_v12 }
  0xeb   :  { %127 = vst.msk [vmem:[#allocation2 + $0x8] sm:$0xff] %vm125_vm1, %v114_v14 }
  0xec   :  { %193 = shalt.err (!%p190_p4)
}
  0xed   :  { %s194_s28 = scalar_lea.hbm %s265_s3, 512 }
  0xee   :  { %p195_p5 = scmp.ne.s32.totalorder %s265_s3, %s194_s28  ;;  %p198_p6 = scmp.lt.u32.totalorder %s194_s28, %s265_s3 }
  0xf0   :  { %p200_p7 = pnand %p198_p6, %p195_p5 }
  0xf2   :  { %203 = shalt.err (!%p200_p7)
}
  0xf3   :  { %s207_s6 = smov 128   ;;  %s208_s7 = smov 8  }
  0xf4   :  { %141 = dma.vmem_to_hbm [thread:$0]  %s136_s27, 512, %s265_s3, [#allocation3], %s207_s6, %s207_s6, %s208_s7  }
  0xf5   :  { %204 = dma.done.wait [#allocation3], 512  }
  0xf6   :  { %205 = vsyncadd [#allocation3], 4294966784 }
  0xf7   :  { %145 = vsyncpa [#allocation3], 1 }

</bundles_post_ra>
